<compile_context>
chip_gen: v7x
topology: tpu7x:2x2x1
jax: 0.10.0
libtpu: 0.0.40
codegen_flags: <defaults>
</compile_context>

<pallas_src>
import functools
import math

import jax
import jax.numpy as jnp
from jax import lax
from jax.experimental import pallas as pl
from jax.experimental.pallas import tpu as pltpu

_NUM_CORES = 2      # leading "parallel" axis: ~2x on v7x (2 TCs), harmless on v5e/v6e
_CHUNK = 16         # rows folded into the accumulator per inner-loop iteration


def _sum_zero_kernel(x_ref, out_ref, acc_ref, *, nr, tile_n, spc, exact):
    """Accumulate column sums of the packed [nr, kp] input into acc (8, kp)."""
    c = pl.program_id(0)            # core-split axis ("parallel")
    s = pl.program_id(1)            # per-core streaming axis ("arbitrary")

    @pl.when(s == 0)
    def _():
        acc_ref[...] = jnp.zeros_like(acc_ref)

    def add_chunk(x):               # x: (_CHUNK, kp) float32
        acc_ref[...] += x.reshape(_CHUNK // 8, 8, x.shape[-1]).sum(axis=0)

    def body(j, carry):
        off = pl.multiple_of(j * _CHUNK, _CHUNK)
        add_chunk(x_ref[pl.ds(off, _CHUNK), :].astype(jnp.float32))
        return carry

    if exact:
        # Every block of every core is completely full: static trip count.
        lax.fori_loop(0, tile_n // _CHUNK, body, 0)
    else:
        # The last block may be partial and (with an odd block count) one core
        # may get a fully out-of-range clamped block.  Handle both with a
        # scalar trip count plus at most one masked chunk: zero per-element
        # masking cost in the steady state.
        row0 = (c * spc + s) * tile_n
        rows_here = jnp.clip(nr - row0, 0, tile_n)
        n_full = rows_here // _CHUNK
        rem = rows_here - n_full * _CHUNK

        lax.fori_loop(0, n_full, body, 0)

        @pl.when(rem > 0)
        def _():
            off = pl.multiple_of(n_full * _CHUNK, _CHUNK)
            x = x_ref[pl.ds(off, _CHUNK), :].astype(jnp.float32)
            rid = lax.broadcasted_iota(jnp.int32, x.shape, 0)
            add_chunk(jnp.where(rid < rem, x, 0.0))

    @pl.when(s == spc - 1)
    def _():
        out_ref[...] = acc_ref[...].reshape(out_ref.shape)


def _choose_packing(n, d):
    """Rows-per-packed-row k so kp = k*d is lane-dense (>=128, ideally %128==0)."""
    if d >= 128:
        return 1
    k = 128 // math.gcd(d, 128)          # kp = lcm(d, 128): a multiple of 128
    if k * d > 2048:                     # cap the packed-row width
        k = -(-128 // d)                 # ceil(128/d): 128 <= kp < 128 + d
    if n % k == 0:
        return k
    # Prefer a divisor of n (free row-major reshape, no prefix copy of the big
    # array) as long as it is still reasonably lane-dense.
    best_k, best_util = 1, 0.0
    for cand in range(1, min(max(1, 2048 // d), n) + 1):
        if n % cand:
            continue
        kp = cand * d
        util = kp / (-(-kp // 128) * 128)
        if util > best_util + 1e-9 or (abs(util - best_util) <= 1e-9 and cand > best_k):
            best_k, best_util = cand, util
    if best_util >= 0.5:
        return best_k
    return k      # no dense divisor: caller slices a prefix (one extra copy)


def _jax_column_sums(x):
    return jnp.sum(x.astype(jnp.float32), axis=0)


def sum_zero_loss(pred, target=None, *, block_bytes=16 * 1024 * 1024):
    """Pallas equivalent of sum_zero_loss.forward (target is unused)."""
    # TODO(synk): only 2-D pred (rows x features) is supported, which matches
    # how HamGNN calls this loss; >2-D middle dims would need a vector output.
    assert pred.ndim == 2, "sum_zero_loss kernel expects a 2-D pred"
    del target                                   # reference module never reads it

    n, d = pred.shape
    assert n >= 1 and d >= 1

    k = _choose_packing(n, d)
    kp = k * d
    nr = n // k                                  # packed rows seen by the kernel
    nm = nr * k                                  # original rows covered by kernel

    itemsize = jnp.dtype(pred.dtype).itemsize
    kp_pad = -(-kp // 128) * 128                 # lane padding inside VMEM
    row_bytes = kp_pad * itemsize
    acc_bytes = 8 * kp_pad * 4
    out_bytes = 2 * _NUM_CORES * 8 * kp_pad * 4
    vmem_budget = 40 * 1024 * 1024               # safe on v5e/v6e (128 MiB) and v7x (64 MiB/TC)

    # Tiny inputs (or absurdly wide rows that cannot fit one block) -> plain XLA.
    if nr == 0 or 2 * _CHUNK * row_bytes + acc_bytes + out_bytes > vmem_budget:
        col = _jax_column_sums(pred)
        return jnp.sqrt(jnp.sum(col * col))

    # Lane-packed view.  When k divides n this reshape is a free row-major view;
    # otherwise we pay one prefix copy (still far better than <50% lane use).
    x = pred.reshape(nr, kp) if nm == n else pred[:nm].reshape(nr, kp)

    # Tile sizing against the *padded* VMEM footprint: 2 double-buffered input
    # blocks + the small f32 accumulator + the tiny per-core output blocks.
    cap_rows = (vmem_budget - acc_bytes - out_bytes - 2 * 1024 * 1024) // (2 * row_bytes)
    per_core = -(-nr // _NUM_CORES)
    tile_n = min(block_bytes // row_bytes, cap_rows, -(-per_core // _CHUNK) * _CHUNK)
    tile_n = max(_CHUNK, (tile_n // _CHUNK) * _CHUNK)

    num_blocks = -(-nr // tile_n)
    spc = -(-num_blocks // _NUM_CORES)           # grid steps per core
    exact = (_NUM_CORES * spc * tile_n == nr)    # all blocks completely full?
    has_overhang = (_NUM_CORES * spc != num_blocks)

    last_block = num_blocks - 1
    if has_overhang:
        in_map = lambda c, s: (jnp.minimum(c * spc + s, last_block), 0)
    else:
        in_map = lambda c, s: (c * spc + s, 0)

    footprint = 2 * tile_n * row_bytes + acc_bytes + out_bytes
    vmem_limit = max(footprint + 4 * 1024 * 1024, 16 * 1024 * 1024)

    kernel = functools.partial(
        _sum_zero_kernel, nr=nr, tile_n=tile_n, spc=spc, exact=exact)

    cost = pl.CostEstimate(
        flops=int(nr * kp),
        transcendentals=0,
        bytes_accessed=int(nr * kp * itemsize + _NUM_CORES * 8 * kp * 4),
    )

    parts = pl.pallas_call(
        kernel,
        out_shape=jax.ShapeDtypeStruct((_NUM_CORES, 8, kp), jnp.float32),
        grid_spec=pltpu.PrefetchScalarGridSpec(
            num_scalar_prefetch=0,
            grid=(_NUM_CORES, spc),
            in_specs=[pl.BlockSpec((tile_n, kp), in_map)],
            out_specs=pl.BlockSpec((1, 8, kp), lambda c, s: (c, 0, 0)),
            scratch_shapes=[pltpu.VMEM((8, kp), jnp.float32)],
        ),
        compiler_params=pltpu.CompilerParams(
            dimension_semantics=("parallel", "arbitrary"),
            vmem_limit_bytes=int(vmem_limit),
        ),
        cost_estimate=cost,
    )(x)

    # Combine per-core partial column sums, undo the k-packing, add the (tiny)
    # leftover rows, then square / sum / sqrt -- all negligible XLA work.
    col = parts.sum(axis=(0, 1)).reshape(k, d).sum(axis=0)      # (d,) float32
    if nm < n:
        col = col + _jax_column_sums(pred[nm:])
    return jnp.sqrt(jnp.sum(col * col))


if __name__ == "__main__":
    key = jax.random.PRNGKey(0)
    k1, k2, k3 = jax.random.split(key, 3)

    def ref_loss(p):
        p = p.astype(jnp.float32)
        return jnp.sqrt(jnp.sum(jnp.sum(p, axis=0) ** 2, axis=-1))

    # Test 1: f32, hidden-like feature dim, exactly tileable (static fast path,
    # both "cores" get full blocks).
    p1 = jax.random.normal(k1, (4096, 32), dtype=jnp.float32)
    o1 = sum_zero_loss(p1, None)
    jax.block_until_ready(o1)
    assert jnp.allclose(o1, ref_loss(p1), rtol=1e-5, atol=1e-4), (o1, ref_loss(p1))

    # Test 2: bf16 force-like D=3 with a ragged row count (divisor packing,
    # partial masked chunk, clamped overhang block on the second core).
    p2 = jax.random.normal(k2, (2600, 3), dtype=jnp.bfloat16)
    o2 = sum_zero_loss(p2, None)
    jax.block_until_ready(o2)
    assert jnp.allclose(o2, ref_loss(p2), rtol=1e-3, atol=1e-3), (o2, ref_loss(p2))

    # Test 3: tiny input -> pure-JAX fallback path.
    p3 = jax.random.normal(k3, (5, 3), dtype=jnp.float32)
    o3 = sum_zero_loss(p3, None)
    jax.block_until_ready(o3)
    assert jnp.allclose(o3, ref_loss(p3), rtol=1e-5, atol=1e-5), (o3, ref_loss(p3))

    print("KERNEL_OK")
</pallas_src>

<mosaic_0001>
module attributes {stable_mosaic.version = 11 : i64} {
  func.func @_sum_zero_kernel(%arg0: i32, %arg1: i32, %arg2: memref<512x128xf32, #tpu.memory_space<vmem>>, %arg3: memref<1x8x128xf32, #tpu.memory_space<vmem>>, %arg4: memref<8x128xf32, #tpu.memory_space<vmem>>) attributes {dimension_semantics = [#tpu.dimension_semantics<parallel>, #tpu.dimension_semantics<arbitrary>], iteration_bounds = array<i64: 2, 1>, scalar_prefetch = 0 : i64, scratch_operands = 1 : i64, tpu.core_type = #tpu.core_type<tc>, window_params = [{transform_indices = @transform_0, window_bounds = array<i64: 512, 128>}, {transform_indices = @transform_1, window_bounds = array<i64: 1, 8, 128>}]} {
    %c0_i32 = arith.constant 0 : i32
    %0 = arith.cmpi eq, %arg1, %c0_i32 : i32
    %1 = arith.extui %0 : i1 to i32
    %c0_i32_0 = arith.constant 0 : i32
    %2 = arith.cmpi ne, %1, %c0_i32_0 : i32
    scf.if %2 {
      %cst = arith.constant 0.000000e+00 : f32
      %7 = vector.broadcast %cst : f32 to vector<8x128xf32>
      %c0 = arith.constant 0 : index
      %c0_5 = arith.constant 0 : index
      %8 = vector.load %arg4[%c0, %c0_5] : memref<8x128xf32, #tpu.memory_space<vmem>>, vector<8x128xf32>
      tpu.vector_store %arg4[%c0, %c0_5], %7 {strides = array<i32>} : memref<8x128xf32, #tpu.memory_space<vmem>>, vector<8x128xf32>,
    } else {
    }
    %c0_i32_1 = arith.constant 0 : i32
    %c32_i32 = arith.constant 32 : i32
    %3 = arith.addi %c0_i32_1, %c32_i32 : i32
    %c1_i32 = arith.constant 1 : i32
    scf.for %arg5 = %c0_i32_1 to %3 step %c1_i32  : i32 {
      %c16_i32 = arith.constant 16 : i32
      %7 = arith.muli %arg5, %c16_i32 : i32
      %8 = tpu.assume_multiple %7, 16 : i32
      %9 = arith.index_cast %8 : i32 to index
      %c0 = arith.constant 0 : index
      %10 = vector.load %arg2[%9, %c0] : memref<512x128xf32, #tpu.memory_space<vmem>>, vector<16x128xf32>
      %c0_5 = arith.constant 0 : index
      %c0_6 = arith.constant 0 : index
      %11 = vector.load %arg4[%c0_5, %c0_6] : memref<8x128xf32, #tpu.memory_space<vmem>>, vector<8x128xf32>
      %12 = vector.shape_cast %10 : vector<16x128xf32> to vector<2x8x128xf32>
      %cst = arith.constant dense<0.000000e+00> : vector<8x128xf32>
      %13 = vector.multi_reduction <add>, %12, %cst [0] : vector<2x8x128xf32> to vector<8x128xf32>
      %14 = arith.addf %11, %13 : vector<8x128xf32>
      %c0_7 = arith.constant 0 : index
      %c0_8 = arith.constant 0 : index
      %15 = vector.load %arg4[%c0_7, %c0_8] : memref<8x128xf32, #tpu.memory_space<vmem>>, vector<8x128xf32>
      tpu.vector_store %arg4[%c0_7, %c0_8], %14 {strides = array<i32>} : memref<8x128xf32, #tpu.memory_space<vmem>>, vector<8x128xf32>,
    }
    %c32_i32_2 = arith.constant 32 : i32
    %c0_i32_3 = arith.constant 0 : i32
    %4 = arith.cmpi eq, %arg1, %c0_i32_3 : i32
    %5 = arith.extui %4 : i1 to i32
    %c0_i32_4 = arith.constant 0 : i32
    %6 = arith.cmpi ne, %5, %c0_i32_4 : i32
    scf.if %6 {
      %c0 = arith.constant 0 : index
      %c0_5 = arith.constant 0 : index
      %7 = vector.load %arg4[%c0, %c0_5] : memref<8x128xf32, #tpu.memory_space<vmem>>, vector<8x128xf32>
      %8 = vector.shape_cast %7 : vector<8x128xf32> to vector<1x8x128xf32>
      %c0_6 = arith.constant 0 : index
      %c0_7 = arith.constant 0 : index
      %c0_8 = arith.constant 0 : index
      %9 = vector.load %arg3[%c0_6, %c0_7, %c0_8] : memref<1x8x128xf32, #tpu.memory_space<vmem>>, vector<1x8x128xf32>
      tpu.vector_store %arg3[%c0_6, %c0_7, %c0_8], %8 {strides = array<i32>} : memref<1x8x128xf32, #tpu.memory_space<vmem>>, vector<1x8x128xf32>,
    } else {
    }
    return
  }
  func.func @transform_0(%arg0: i32, %arg1: i32) -> (i32, i32) {
    %c1_i32 = arith.constant 1 : i32
    %0 = arith.muli %arg0, %c1_i32 : i32
    %1 = arith.addi %0, %arg1 : i32
    %c0_i32 = arith.constant 0 : i32
    %c0_i32_0 = arith.constant 0 : i32
    return %1, %c0_i32 : i32, i32
  }
  func.func @transform_1(%arg0: i32, %arg1: i32) -> (i32, i32, i32) {
    %c0_i32 = arith.constant 0 : i32
    %c0_i32_0 = arith.constant 0 : i32
    %c0_i32_1 = arith.constant 0 : i32
    return %arg0, %c0_i32, %c0_i32_0 : i32, i32, i32
  }
}

</mosaic_0001>

<bundles_post_ra>
// kernel: tpu_custom_call.1
= control target key start
LH: loop header
LB: loop body
LE: loop exit
PB: predicated region body
PF: predicated region fallthrough
CT: control target
= control target key end

     0   :  { %6 = vsyncpa [#allocation4], 0  ;;  %s670_s0 = inlined_call_operand.hbm [shape: f32[1024,128], index: 0, kind: input, shape index: {}]   ;;  %s671_s1 = inlined_call_operand.hbm [shape: f32[2,8,128], index: 1, kind: output, shape index: {}]  }
   0x1   :  { %8 = vsyncpa [#allocation4 + $0x1], 0 }
   0x2   :  { %9 = vsyncpa [#allocation5], 0 }
   0x3   :  { %11 = vsyncpa [#allocation5 + $0x1], 0  ;;  %s502_s6 = smov 0   ;;  %s504_s7 = smov 0  }
   0x4   :  { %s506_s8 = smov 0   ;;  %s508_s9 = smov 0  }
   0x5   :  { %s510_s10 = smov 0   ;;  %s512_s11 = smov 0  }
   0x6 LB: > { %s276_s12 = sadd.s32 4294967295, %s481_s11   ;;  %s277_s13 = sadd.s32 4294967294, %s481_s11   ;;  %s481_s11 = sphi %s512_s11, %s17_s11   ;;  %s477_s10 = sphi %s510_s10, %s686_s10   ;;  %s473_s9 = sphi %s508_s9, %s685_s9   ;;  %s469_s8 = sphi %s506_s8, %s684_s8   ;;  %s465_s7 = sphi %s504_s7, %s683_s7   ;;  %s461_s6 = sphi %s502_s6, %s682_s6  }
   0x7   : > { %s29_s14 = sadd.s32 1, %s477_s10  ;;  %s38_s15 = sadd.s32 1, %s469_s8 }
   0x8   : > { %p31_p0 = scmp.ge.s32.totalorder %s29_s14, 2  ;;  %p45_p1 = scmp.ne.s32.totalorder %s469_s8, %s465_s7 }
   0x9   : > { %p46_p2 = scmp.eq.s32.totalorder %s481_s11, 0  ;;  %p51_p3 = scmp.ne.s32.totalorder %s465_s7, %s461_s6 }
   0xa   : > { %s688_s14 = smov (%p31_p0, %s29_s14), 0  ;;  %p52_p5 = scmp.eq.s32.totalorder %s276_s12, 0 }
   0xb   : > { %p543_p4 = por %p46_p2, %p45_p1  ;;  %s35_s17 = ssub.s32 %s477_s10, %s688_s14 }
   0xc   : > { %p75_p6 = scmp.eq.s32.totalorder %s276_s12, 1  ;;  %p36_p7 = scmp.eq.s32.totalorder %s35_s17, 0 }
   0xd   : > { %p549_p8 = por %p52_p5, %p51_p3  ;;  %p81_p10 = scmp.eq.s32.totalorder %s277_s13, 1 }
   0xe   : > { %p553_p9 = por %p75_p6, %p45_p1  ;;  %p304_p13 = scmp.lt.s32.totalorder %s481_s11, 2 }
   0xf   : > { %s558_s20 = scalar_select %p36_p7, %s469_s8, %s38_s15  }
  0x10   : > { %s675_s19 = scalar_select %p553_p9, 1, 0 }
  0x11   : > { %p560_p11 = por %p81_p10, %p51_p3  ;;  %s101_s22 = sand.u32 1, %s469_s8  }
  0x12   : > { %s280_s23 = sshll.u32 %s101_s22, 9  ;;  %s291_s24 = sshll.u32 %s477_s10, 13 }
  0x13   : > { %s676_s21 = scalar_select %p560_p11, 1, 0 }
  0x14   : > { %s571_s27 = scalar_lea.hbm %s670_s0, %s291_s24  ;;  %s105_s28 = scalar_lea.vmem [#allocation3], %s280_s23 }
  0x15   : > { %s113_s29 = sshll.u32 %s105_s28, 4  ;;  %p577_p0 = pnand %p304_p13, %p543_p4  ;;  %s573_s29 = int_to_ptr.vmem [resolvable:$true] %s113_s29 }
  0x16   : > { %s582_s2 = scalar_lea.sflag [#allocation4], %s101_s22  ;;  %s365_s3 = scalar_lea.hbm %s571_s27, 8192 }
  0x17   : > { %p366_p2 = scmp.ne.s32.totalorder %s571_s27, %s365_s3  ;;  %p367_p3 = pneg %p577_p0 }
  0x18   : > { %s370_s12 = scalar_lea.hbm %s670_s0, 16384  ;;  %p371_p4 = scmp.lt.u32.totalorder %s571_s27, %s670_s0 }
  0x19   : > { %p368_p5 = pnand %p367_p3, %p366_p2  ;;  %p372_p7 = scmp.lt.u32.totalorder %s370_s12, %s365_s3 }
  0x1a   : > { %p374_p13 = scmp.lt.u32.totalorder %s365_s3, %s571_s27 }
  0x1b   : > { %p369_p6 = pneg %p368_p5  ;;  %p373_p10 = por %p372_p7, %p371_p4 }
  0x1d   : > { %p375_p12 = por %p374_p13, %p373_p10 }
  0x1f   : > { %p376_p1 = pnand %p375_p12, %p369_p6 }
  0x21   : > { %379 = shalt.err (!%p376_p1)
}
  0x22   : > { %s380_s16 = scalar_lea.vmem %s573_s29, 8192  ;;  %s487_s17 = smov [#allocation3]  }
  0x23   : > { %p381_p2 = scmp.ne.s32.totalorder %s573_s29, %s380_s16  ;;  %s385_s22 = sshll.u32 %s487_s17, 4  ;;  %s386_s22 = int_to_ptr.vmem [resolvable:$false] %s385_s22 }
  0x24   : > { %s387_s23 = scalar_lea.vmem %s386_s22, 16384  ;;  %p388_p9 = scmp.lt.s32.totalorder %s573_s29, %s386_s22 }
  0x25   : > { %p383_p5 = pnand %p381_p2, %p367_p3  ;;  %p389_p4 = scmp.lt.s32.totalorder %s387_s23, %s380_s16 }
  0x27   : > { %p384_p11 = pneg %p383_p5  ;;  %p390_p7 = por %p389_p4, %p388_p9 }
  0x29   : > { %p391_p10 = pnand %p390_p7, %p384_p11 }
  0x2b   : > { %394 = shalt.err (!%p391_p10)
}
  0x2c   : > { %s488_s24 = smov 128   ;;  %s489_s25 = smov 8  }
  0x2d   : > { %299 = dma.hbm_to_vmem [thread:$0]  (!%p577_p0), %s571_s27, 8192, %s573_s29, %s582_s2, %s488_s24, %s488_s24, %s489_s25  }
  0x2e   : > { %p121_p12 = scmp.lt.s32.totalorder %s481_s11, 3  ;;  %p678_p1 = scmp.ge.s32.totalorder %s481_s11, 1 }
  0x30   : > { %p122_p3 = pnand %p678_p1, %p121_p12 }
  0x31   : > { %s614_s26 = sand.u32 (!%p122_p3), 1, %s465_s7  }
  0x32   : > { %125 = sbr.rel (%p122_p3) target bundleno = 91 (0x5b), region = 24  ;;  %s284_s28 = sshll.u32 (!%p122_p3), %s614_s26, 9 }
  0x33   : > { %s128_s3 = scalar_lea.sflag (!%p122_p3), [#allocation4], %s614_s26  ;;  %s131_s4 = scalar_lea.vmem (!%p122_p3), [#allocation3], %s284_s28 }
  0x39   : > { %452 = dma.done.wait (%p549_p8), %s128_s3, 8192  }
  0x3a   : > { %454 = vsyncadd (%p549_p8), %s128_s3, 4294959104  ;;  %s285_s27 = sshll.u32 %s614_s26, 3  ;;  %v490_v0 = vmov 0.0   ;;  %s483_s30 = smov 0  }
  0x3b   : > { %156 = vst [vmem:[#allocation2] sm:$0xff] %v490_v0  ;;  %s149_s29 = scalar_lea.vmem [#allocation6], %s285_s27 }
  0x3c LB: >> { %s286_s2 = sshll.u32 %s485_s30, 4  ;;  %s162_s30 = sadd.s32 1, %s485_s30   ;;  %s485_s30 = sphi %s483_s30, %s162_s30  }
  0x3d   : >> { %s164_s5 = scalar_lea.vmem %s131_s4, %s286_s2 [#allocation3]  ;;  %p159_p9 = scmp.ge.s32.totalorder %s162_s30, 32  }
  0x3e   : >> { %v165_v1 = vld [vmem:[%s164_s5] sm:$0xff]  ;;  %v166_v2 = vld [vmem:[%s164_s5 + $0x8] sm:$0xff]  ;;  %s288_s18 = sshll.u32 (%p159_p9), %s473_s9, 7  ;;  %s190_s16 = sshll.u32 (%p159_p9), %s149_s29, 4  ;;  %s191_s16 = int_to_ptr.vmem [resolvable:$true] %s190_s16 }
  0x3f   : >> { %v168_v4 = vadd.f32 %v166_v2, %v165_v1  ;;  %161 = sbr.rel (!%p159_p9) target bundleno = 60 (0x3c), region = 85  ;;  %s627_s15 = scalar_lea.hbm (%p159_p9), %s671_s1, %s288_s18 }
  0x40   : > { %s177_s17 = scalar_lea.sflag (%p159_p9), [#allocation5], %s614_s26  ;;  %s395_s22 = scalar_lea.vmem (%p159_p9), %s191_s16, 128 }
  0x41   : > { %p396_p8 = scmp.ne.s32.totalorder (%p159_p9), %s191_s16, %s395_s22  ;;  %p679_p11 = scmp.ne.s32.totalorder (%p159_p9), %s675_s19, 0 }
  0x42   : >> { %v167_v3 = vld [vmem:[#allocation2] sm:$0xff]  ;;  %s491_s23 = smov (%p159_p9), [#allocation6]  }
  0x43   : >> { %v169_v5 = vadd.f32 %v168_v4, %v167_v3  ;;  %p397_p0 = pnand (%p159_p9), %p396_p8, %p679_p11  ;;  %s399_s24 = sshll.u32 (%p159_p9), %s491_s23, 4  ;;  %s400_s24 = int_to_ptr.vmem [resolvable:$false] %s399_s24 }
  0x44   : > { %s401_s25 = scalar_lea.vmem (%p159_p9), %s400_s24, 256  ;;  %p402_p13 = scmp.lt.s32.totalorder (%p159_p9), %s191_s16, %s400_s24 }
  0x45   : >> { %170 = vst [vmem:[#allocation2] sm:$0xff] %v169_v5  ;;  %p398_p6 = pneg (%p159_p9), %p397_p0  ;;  %p403_p2 = scmp.lt.s32.totalorder (%p159_p9), %s401_s25, %s395_s22 }
  0x47   : > { %p404_p5 = por %p403_p2, %p402_p13 }
  0x49   : > { %p405_p4 = pnand %p404_p5, %p398_p6 }
  0x4c   : > { %v174_v6 = vld [vmem:[#allocation2] sm:$0xff] }
  0x4d   : > { %175 = vst [vmem:[%s149_s29] sm:$0xff] %v174_v6 }
  0x4e   : > { %408 = shalt.err (!%p405_p4)
}
  0x4f   : > { %s409_s9 = scalar_lea.hbm %s627_s15, 128  ;;  %s413_s3 = scalar_lea.hbm %s671_s1, 256 }
  0x50   : > { %p410_p7 = scmp.ne.s32.totalorder %s627_s15, %s409_s9  ;;  %p414_p1 = scmp.lt.u32.totalorder %s627_s15, %s671_s1 }
  0x51   : > { %p415_p3 = scmp.lt.u32.totalorder %s413_s3, %s409_s9  ;;  %p417_p8 = scmp.lt.u32.totalorder %s409_s9, %s627_s15 }
  0x52   : > { %p411_p10 = pnand %p410_p7, %p679_p11 }
  0x53   : > { %p416_p9 = por %p415_p3, %p414_p1 }
  0x54   : > { %p412_p12 = pneg %p411_p10 }
  0x55   : > { %p418_p0 = por %p417_p8, %p416_p9 }
  0x57   : > { %p419_p6 = pnand %p418_p0, %p412_p12 }
  0x59   : > { %422 = shalt.err (!%p419_p6)
}
  0x5a   : > { %294 = dma.vmem_to_hbm [thread:$0]  (%p679_p11), %s191_s16, 128, %s627_s15, %s177_s17  }
  0x5b PF: > { %s202_s29 = sand.u32 1, %s461_s6   ;;  %p680_p13 = scmp.ne.s32.totalorder %s676_s21, 0 }
  0x5c   : > { %p681_p2 = scmp.ge.s32.totalorder %s481_s11, 2  ;;  %s203_s30 = scalar_lea.sflag [#allocation5], %s202_s29 }
  0x5e   : > { %p301_p5 = pnand %p681_p2, %p680_p13 }
  0x60   : > { %456 = dma.done.wait (!%p301_p5), %s203_s30, 128  }
  0x61   : > { %458 = vsyncadd (!%p301_p5), %s203_s30, 4294967168  ;;  %s17_s11 = sadd.s32 1, %s481_s11   ;;  %s682_s6 = smov %s465_s7 }
  0x62   : > { %p14_p4 = scmp.ge.s32.totalorder %s17_s11, 4   ;;  %s683_s7 = smov %s469_s8 }
  0x63   : > { %s684_s8 = smov %s558_s20  ;;  %s685_s9 = smov %s477_s10 }
  0x64   : > { %s686_s10 = smov %s688_s14  ;;  %16 = sbr.rel (!%p14_p4) target bundleno = 6 (0x6), region = 96 }
  0x6b   :  { %208 = vsyncpa [#allocation4], 1 }
  0x6c   :  { %210 = vsyncpa [#allocation4 + $0x1], 1 }
  0x6d   :  { %211 = vsyncpa [#allocation5], 1 }
  0x6e   :  { %213 = vsyncpa [#allocation5 + $0x1], 1 }

</bundles_post_ra>
